<compile_context>
chip_gen: v7x
topology: tpu7x:2x2x1
jax: 0.10.0
libtpu: 0.0.40
codegen_flags: <defaults>
</compile_context>

<pallas_src>
import jax
import jax.numpy as jnp
from jax.experimental import pallas as pl
from jax.experimental.pallas import tpu as pltpu


def _ordinal_loss_kernel(pred_ref, tgt_ref, w_ref, out_ref):
    """One batch tile, class-major layout.

    pred_ref: (C, TB)  predictions (native dtype), batch on the lane axis
    tgt_ref : (1, TB)  int32 targets (padded lanes hold -1 -> contribute 0)
    w_ref   : (C, 1)   f32 per-class weight, already scaled by 1/C
    out_ref : (8, 128) f32 slab; this tile's partial sum goes into [0, 0]
    """
    pred = pred_ref[...].astype(jnp.float32)              # (C, TB) f32
    tgt = tgt_ref[...]                                     # (1, TB) int32
    w = w_ref[...]                                         # (C, 1)  f32 (has 1/C)

    # ordinal encoding: modified[c, b] = 1.0 iff c <= targets[b]
    cls = jax.lax.broadcasted_iota(jnp.int32, pred.shape, dimension=0)
    modified = (cls <= tgt).astype(jnp.float32)            # broadcast over sublanes

    diff = pred - modified
    partial = jnp.sum(diff * diff * w)                     # scalar f32 partial sum

    # place the scalar at [0, 0] of this grid step's (8, 128) output block
    r = jax.lax.broadcasted_iota(jnp.int32, out_ref.shape, 0)
    c = jax.lax.broadcasted_iota(jnp.int32, out_ref.shape, 1)
    out_ref[...] = jnp.where((r == 0) & (c == 0), partial, 0.0).astype(out_ref.dtype)


def _round_up(x, m):
    return ((x + m - 1) // m) * m


def ordinal_loss(predictions, targets, weight_class=None, *, block_b=2048):
    """Pallas TPU implementation of OrdinalLoss.forward.

    predictions: (B, C) float (f32 or bf16 — bf16 is shipped through HBM as-is)
    targets:     (B,)   int
    weight_class: optional (C,) float32
    Returns a float32 scalar.
    """
    B, C = predictions.shape
    if B == 0:
        # PyTorch module returns python 0 for an empty batch; keep that glue here.
        return jnp.float32(0.0)

    # class-major / lane-dense layout: classes on sublanes, batch on lanes
    pred_t = jnp.asarray(predictions).T                           # (C, B)
    tgt = jnp.asarray(targets, dtype=jnp.int32).reshape(1, B)     # (1, B)

    # fold 1/C (and the default all-ones weight) into a resident (C, 1) vector
    if weight_class is None:
        w = jnp.full((C, 1), 1.0 / C, dtype=jnp.float32)
    else:
        w = (jnp.asarray(weight_class, dtype=jnp.float32) / C).reshape(C, 1)

    # batch tile size: multiple of 128 lanes, at most block_b
    tb = _round_up(min(block_b, _round_up(B, 128)), 128)
    b_pad = _round_up(B, tb)
    if b_pad != B:
        pad = b_pad - B
        # padded predictions = 0, padded targets = -1  =>  encoding 0, loss 0
        pred_t = jnp.pad(pred_t, ((0, 0), (0, pad)))
        tgt = jnp.pad(tgt, ((0, 0), (0, pad)), constant_values=-1)

    num_blocks = b_pad // tb
    grid = (num_blocks,)

    itemsize = jnp.dtype(pred_t.dtype).itemsize
    cost = pl.CostEstimate(
        flops=4 * b_pad * C,
        transcendentals=0,
        bytes_accessed=b_pad * C * itemsize + b_pad * 4 + C * 4
        + 8 * 128 * num_blocks * 4,
    )

    partials = pl.pallas_call(
        _ordinal_loss_kernel,
        out_shape=jax.ShapeDtypeStruct((8, 128 * num_blocks), jnp.float32),
        grid=grid,
        in_specs=[
            pl.BlockSpec((C, tb), lambda i: (0, i)),   # predictions tile (C, TB)
            pl.BlockSpec((1, tb), lambda i: (0, i)),   # targets tile, lane-dense
            pl.BlockSpec((C, 1), lambda i: (0, 0)),    # scaled class weights (resident)
        ],
        out_specs=pl.BlockSpec((8, 128), lambda i: (0, i)),  # one slab per grid step
        compiler_params=pltpu.CompilerParams(
            dimension_semantics=("parallel",),         # megacore-shardable on v7x
        ),
        cost_estimate=cost,
    )(pred_t, tgt, w)

    # finish the (tiny) reduction in plain JAX: only [0, 0] of each slab is nonzero
    return jnp.sum(partials)


def _ordinal_loss_ref(predictions, targets, weight_class=None):
    """Pure-JAX reference mirroring the PyTorch forward exactly."""
    B, C = predictions.shape
    col = jnp.arange(C)[None, :]
    modified = (col <= jnp.asarray(targets)[:, None]).astype(jnp.float32)
    se = (predictions.astype(jnp.float32) - modified) ** 2
    if weight_class is not None:
        se = se * jnp.asarray(weight_class, jnp.float32)[None, :]
    return jnp.sum(jnp.mean(se, axis=1))


if __name__ == "__main__":
    key = jax.random.PRNGKey(0)
    kp, kt, kw, kp2, kt2 = jax.random.split(key, 5)

    B, C = 8, 10  # batch of 8, 10 ordinal classes
    predictions = jax.random.uniform(kp, (B, C), dtype=jnp.float32)
    targets = jax.random.randint(kt, (B,), 0, C, dtype=jnp.int32)
    weight_class = jax.random.uniform(kw, (C,), dtype=jnp.float32) + 0.5

    # unweighted path (default __init__: weight_class=None)
    out_unw = jax.block_until_ready(ordinal_loss(predictions, targets))
    ref_unw = _ordinal_loss_ref(predictions, targets)
    assert jnp.allclose(out_unw, ref_unw, rtol=1e-5, atol=1e-5), (out_unw, ref_unw)

    # weighted path
    out_w = jax.block_until_ready(ordinal_loss(predictions, targets, weight_class))
    ref_w = _ordinal_loss_ref(predictions, targets, weight_class)
    assert jnp.allclose(out_w, ref_w, rtol=1e-5, atol=1e-5), (out_w, ref_w)

    # bf16-through-HBM path (upcast happens inside the kernel)
    pred_bf16 = predictions.astype(jnp.bfloat16)
    out_bf = jax.block_until_ready(ordinal_loss(pred_bf16, targets, weight_class))
    ref_bf = _ordinal_loss_ref(pred_bf16.astype(jnp.float32), targets, weight_class)
    assert jnp.allclose(out_bf, ref_bf, rtol=1e-4, atol=1e-4), (out_bf, ref_bf)

    # multi-tile grid + lane padding path (3 grid steps, padded 300 -> 384)
    B2 = 300
    predictions2 = jax.random.uniform(kp2, (B2, C), dtype=jnp.float32)
    targets2 = jax.random.randint(kt2, (B2,), 0, C, dtype=jnp.int32)
    out_g = jax.block_until_ready(
        ordinal_loss(predictions2, targets2, weight_class, block_b=128))
    ref_g = _ordinal_loss_ref(predictions2, targets2, weight_class)
    assert jnp.allclose(out_g, ref_g, rtol=1e-5, atol=1e-5), (out_g, ref_g)

    print("KERNEL_OK")
</pallas_src>

<mosaic_0001>
module attributes {stable_mosaic.version = 11 : i64} {
  func.func @_ordinal_loss_kernel(%arg0: i32, %arg1: memref<10x128xf32, #tpu.memory_space<vmem>>, %arg2: memref<1x128xi32, #tpu.memory_space<vmem>>, %arg3: memref<10x1xf32, #tpu.memory_space<vmem>>, %arg4: memref<8x128xf32, #tpu.memory_space<vmem>>) attributes {dimension_semantics = [#tpu.dimension_semantics<parallel>], iteration_bounds = array<i64: 1>, scalar_prefetch = 0 : i64, scratch_operands = 0 : i64, tpu.core_type = #tpu.core_type<tc>, window_params = [{transform_indices = @transform_0, window_bounds = array<i64: 10, 128>}, {transform_indices = @transform_1, window_bounds = array<i64: 1, 128>}, {pipeline_mode = #tpu.pipeline_mode<synchronous>, transform_indices = @transform_2, window_bounds = array<i64: 10, 1>}, {transform_indices = @transform_3, window_bounds = array<i64: 8, 128>}]} {
    %c0 = arith.constant 0 : index
    %c0_0 = arith.constant 0 : index
    %0 = vector.load %arg1[%c0, %c0_0] : memref<10x128xf32, #tpu.memory_space<vmem>>, vector<10x128xf32>
    %c0_1 = arith.constant 0 : index
    %c0_2 = arith.constant 0 : index
    %1 = vector.load %arg2[%c0_1, %c0_2] : memref<1x128xi32, #tpu.memory_space<vmem>>, vector<1x128xi32>
    %c0_3 = arith.constant 0 : index
    %c0_4 = arith.constant 0 : index
    %2 = vector.load %arg3[%c0_3, %c0_4] : memref<10x1xf32, #tpu.memory_space<vmem>>, vector<10x1xf32>
    %3 = tpu.iota {dimensions = array<i32: 0>} : vector<10x128xi32>
    %4 = vector.broadcast %1 : vector<1x128xi32> to vector<10x128xi32>
    %5 = arith.cmpi sle, %3, %4 : vector<10x128xi32>
    %6 = arith.extui %5 : vector<10x128xi1> to vector<10x128xi32>
    %7 = arith.sitofp %6 : vector<10x128xi32> to vector<10x128xf32>
    %8 = arith.subf %0, %7 : vector<10x128xf32>
    %9 = arith.mulf %8, %8 : vector<10x128xf32>
    %10 = vector.broadcast %2 : vector<10x1xf32> to vector<10x128xf32>
    %11 = arith.mulf %9, %10 : vector<10x128xf32>
    %12 = vector.shape_cast %11 : vector<10x128xf32> to vector<1x10x128xf32>
    %cst = arith.constant dense<0.000000e+00> : vector<1xf32>
    %13 = vector.multi_reduction <add>, %12, %cst [1, 2] : vector<1x10x128xf32> to vector<1xf32>
    %14 = vector.shape_cast %13 : vector<1xf32> to vector<1x1x1xf32>
    %15 = vector.extract %14[0, 0, 0] : f32 from vector<1x1x1xf32>
    %16 = tpu.iota {dimensions = array<i32: 0>} : vector<8x128xi32>
    %17 = tpu.iota {dimensions = array<i32: 1>} : vector<8x128xi32>
    %c0_i32 = arith.constant 0 : i32
    %18 = vector.broadcast %c0_i32 : i32 to vector<8x128xi32>
    %19 = arith.cmpi eq, %16, %18 : vector<8x128xi32>
    %c0_i32_5 = arith.constant 0 : i32
    %20 = vector.broadcast %c0_i32_5 : i32 to vector<8x128xi32>
    %21 = arith.cmpi eq, %17, %20 : vector<8x128xi32>
    %22 = arith.andi %19, %21 : vector<8x128xi1>
    %cst_6 = arith.constant 0.000000e+00 : f32
    %23 = vector.broadcast %15 : f32 to vector<8x128xf32>
    %24 = vector.broadcast %cst_6 : f32 to vector<8x128xf32>
    %25 = arith.select %22, %23, %24 : vector<8x128xi1>, vector<8x128xf32>
    %c0_7 = arith.constant 0 : index
    %c0_8 = arith.constant 0 : index
    %26 = vector.load %arg4[%c0_7, %c0_8] : memref<8x128xf32, #tpu.memory_space<vmem>>, vector<8x128xf32>
    tpu.vector_store %arg4[%c0_7, %c0_8], %25 {strides = array<i32>} : memref<8x128xf32, #tpu.memory_space<vmem>>, vector<8x128xf32>,
    return
  }
  func.func @transform_0(%arg0: i32) -> (i32, i32) {
    %c0_i32 = arith.constant 0 : i32
    %c0_i32_0 = arith.constant 0 : i32
    return %c0_i32, %arg0 : i32, i32
  }
  func.func @transform_1(%arg0: i32) -> (i32, i32) {
    %c0_i32 = arith.constant 0 : i32
    %c0_i32_0 = arith.constant 0 : i32
    return %c0_i32, %arg0 : i32, i32
  }
  func.func @transform_2(%arg0: i32) -> (i32, i32) {
    %c0_i32 = arith.constant 0 : i32
    %c0_i32_0 = arith.constant 0 : i32
    %c0_i32_1 = arith.constant 0 : i32
    return %c0_i32, %c0_i32_0 : i32, i32
  }
  func.func @transform_3(%arg0: i32) -> (i32, i32) {
    %c0_i32 = arith.constant 0 : i32
    %c0_i32_0 = arith.constant 0 : i32
    return %c0_i32, %arg0 : i32, i32
  }
}

</mosaic_0001>

<bundles_post_ra>
// kernel: tpu_custom_call.1
= control target key start
LH: loop header
LB: loop body
LE: loop exit
PB: predicated region body
PF: predicated region fallthrough
CT: control target
= control target key end

     0   :  { %v116_v1 = vmov 0   ;;  %s166_s0 = inlined_call_operand.vmem [shape: f32[10,128], index: 0, kind: input, shape index: {}]   ;;  %s167_s1 = inlined_call_operand.vmem [shape: s32[1,128], index: 1, kind: input, shape index: {}]   ;;  %s168_s2 = inlined_call_operand.vmem [shape: f32[10,1], index: 2, kind: input, shape index: {}]   ;;  %s169_s3 = inlined_call_operand.hbm [shape: f32[8,128], index: 3, kind: output, shape index: {}]  }
   0x1   :  { %v19_v0 = vld [vmem:[%s168_s2 + $0x8] sm:$0x3]  ;;  %91 = vset.pattern.permute.xlu0 %v116_v1 }
   0x2   :  { %44 = vperm.xlu0 %91, %v19_v0  }
   0x3   :  { %8 = vsyncpa [#allocation3], 0  ;;  %v18_v2 = vld [vmem:[%s168_s2] sm:$0xff]  ;;  %v20_v3 = vlaneseq  ;;  %v16_v7 = vld [vmem:[%s166_s0 + $0x8] sm:$0x3]  ;;  %v117_v8 = vmov 0.0  }
   0x4   :  { %v83_v6 = vld [vmem:[%s167_s1] ss:$0 sm:$0xff]  ;;  %vm49_vm2 = vcmask 1041408  }
   0x5   :  { %v21_v4 = vshrl.u32 %v20_v3, 7  ;;  %v15_v11 = vld [vmem:[%s166_s0] sm:$0xff]  ;;  %v62_v29 = vand.u32 127, %v20_v3  ;;  %s118_s0 = smov [#allocation2]  }
   0x6   :  { %39 = vperm.xlu0 %91, %v18_v2   ;;  %s75_s1 = sshll.u32 %s118_s0, 4  ;;  %s76_s1 = int_to_ptr.vmem [resolvable:$true] %s75_s1 }
   0x7   :  { %v22_v5 = vadd.s32 8, %v21_v4  ;;  %vm27_vm1 = vcmp.le.s32.totalorder %v21_v4, %v83_v6  ;;  %vm63_vm3 = vcmp.eq.s32.totalorder %v21_v4, 0  ;;  %vm64_vm4 = vcmp.eq.s32.totalorder %v62_v29, 0  ;;  %s92_s22 = scalar_lea.vmem %s76_s1, 128  ;;  %p97_p1 = scmp.lt.s32.totalorder %s76_s1, %s76_s1 }
   0x8   :  { %v84_v12 = vsel %vm27_vm1, 1.0, %v117_v8  ;;  %vm65_vm5 = vmand %vm63_vm3, %vm64_vm4  ;;  %p93_p0 = scmp.ne.s32.totalorder %s76_s1, %s92_s22  ;;  %p98_p2 = scmp.lt.s32.totalorder %s92_s22, %s92_s22 }
   0x9   :  { %vm28_vm0 = vcmp.le.s32.totalorder %v22_v5, %v83_v6  ;;  %v33_v13 = vsub.f32 %v15_v11, %v84_v12 }
   0xa   :  { %v85_v9 = vsel %vm28_vm0, 1.0, %v117_v8  ;;  %p99_p3 = por %p98_p2, %p97_p1 }
   0xb   :  { %v34_v10 = vsub.f32 %v16_v7, %v85_v9  ;;  %v35_v16 = vmul.f32 %v33_v13, %v33_v13 }
   0xc   :  { %p100_p4 = pnand %p99_p3, %p93_p0 }
   0xd   :  { %v36_v14 = vmul.f32 %v34_v10, %v34_v10 }
  0x81   :  { %v45_v15 = vpop.permute.xlu0 %44 }
  0x82   :  { %v48_v17 = vmul.f32 %v45_v15, %v36_v14 }
  0x84   :  { %v50_v20 = vsel %vm49_vm2, %v48_v17, 0.0 }
  0x85   :  { %v40_v18 = vpop.permute.xlu0 %39 }
  0x86   :  { %v47_v19 = vmul.f32 %v40_v18, %v35_v16 }
  0x88   :  { %v51_v21 = vadd.f32 %v50_v20, %v47_v19 }
  0x8a   :  { %52 = vadd.xlane.f32.xlu1 %v51_v21 }
 0x117   :  { %v53_v22 = vpop.xlane.xlu1 %52 }
 0x118   :  { %v54_v23 = vrot.slane %v53_v22, 4 }
 0x11a   :  { %v55_v24 = vadd.f32 %v54_v23, %v53_v22 }
 0x11c   :  { %v56_v25 = vrot.slane %v55_v24, 2 }
 0x11e   :  { %v57_v26 = vadd.f32 %v56_v25, %v55_v24 }
 0x120   :  { %v58_v27 = vrot.slane %v57_v26, 1 }
 0x122   :  { %v59_v28 = vadd.f32 %v58_v27, %v57_v26 }
 0x124   :  { %86 = vpush %v59_v28 }
 0x155   :  { %s87_s2 = spop %86 }
 0x156   :  { %v66_v30 = vstv %s87_s2 }
 0x157   :  { %v67_v31 = vsel %vm65_vm5, %v66_v30, 0.0 }
 0x158   :  { %68 = vst [vmem:[#allocation2] sm:$0xff] %v67_v31 }
 0x159   :  { %103 = shalt.err (!%p100_p4)
}
 0x15a   :  { %s104_s25 = scalar_lea.hbm %s169_s3, 128 }
 0x15b   :  { %p105_p5 = scmp.ne.s32.totalorder %s169_s3, %s104_s25  ;;  %p108_p6 = scmp.lt.u32.totalorder %s104_s25, %s169_s3 }
 0x15d   :  { %p110_p7 = pnand %p108_p6, %p105_p5 }
 0x15f   :  { %113 = shalt.err (!%p110_p7)
}
 0x160   :  { %78 = dma.vmem_to_hbm [thread:$0]  %s76_s1, 128, %s169_s3, [#allocation3]  }
 0x161   :  { %114 = dma.done.wait [#allocation3], 128  }
 0x162   :  { %115 = vsyncadd [#allocation3], 4294967168 }
 0x163   :  { %82 = vsyncpa [#allocation3], 1 }

</bundles_post_ra>
